<compile_context>
chip_gen: v5e
topology: v5e:2x2
jax: 0.10.0
libtpu: 0.0.40
codegen_flags: <defaults>
</compile_context>

<pallas_src>
import math
import functools

import jax
import jax.numpy as jnp
from jax.experimental import pallas as pl
from jax.experimental.pallas import tpu as pltpu


_LN10000 = math.log(10000.0)
_HALF_PI = math.pi / 2.0


def _pe_kernel(x_ref, o_ref, *, tile_s, batch, d_model, p_drop, train, seed):
    """x_ref/o_ref: (tile_s, batch*d_model), lane-dense in batch*d_model."""
    seq_off = pl.program_id(0) * tile_s  # int32 scalar

    # ---- positional encoding: one sin per (row, d_model) element -----------
    dim = jax.lax.broadcasted_iota(jnp.int32, (1, d_model), 1)            # (1, D)
    two_k = (dim - (dim % 2)).astype(jnp.float32)
    inv_freq = jnp.exp(two_k * (-_LN10000 / d_model))                     # only D exps
    phase = (dim % 2).astype(jnp.float32) * _HALF_PI                      # cos(t)=sin(t+pi/2)
    pos = (jax.lax.broadcasted_iota(jnp.int32, (tile_s, d_model), 0)
           + seq_off).astype(jnp.float32)                                 # (tile_s, D)
    pe = jnp.sin(pos * inv_freq + phase)                                  # (tile_s, D)
    pe = jnp.tile(pe, (1, batch)).astype(x_ref.dtype)                     # (tile_s, B*D) VPU copies

    y = x_ref[...] + pe

    # ---- dropout (train only) ----------------------------------------------
    # TODO(synk): torch.nn.Dropout's exact RNG stream is not reproducible; this
    # uses a stateless counter-hash PRNG with identical keep-prob/scale semantics.
    if train and p_drop > 0.0:
        bd = batch * d_model
        row = jax.lax.broadcasted_iota(jnp.uint32, (tile_s, bd), 0)
        col = jax.lax.broadcasted_iota(jnp.uint32, (tile_s, bd), 1)
        gidx = (seq_off.astype(jnp.uint32) + row) * jnp.uint32(bd) + col
        # lowbias32-style mixer: decorrelated bits per element and per seed.
        h = gidx ^ jnp.uint32((seed * 0x9E3779B9) & 0xFFFFFFFF)
        h = (h ^ (h >> 16)) * jnp.uint32(0x7FEB352D)
        h = (h ^ (h >> 15)) * jnp.uint32(0x846CA68B)
        h = h ^ (h >> 16)
        thr = jnp.uint32(min(int(round(p_drop * 2.0 ** 32)), 2 ** 32 - 1))
        keep = h >= thr                                   # P(keep) = 1 - p_drop
        scale = jnp.asarray(1.0 / (1.0 - p_drop), y.dtype)
        y = jnp.where(keep, y * scale, jnp.zeros_like(y))

    o_ref[...] = y.astype(o_ref.dtype)


def _choose_tile_s(seq_len, row_bytes, target_bytes=1 << 20):
    """Largest seq-tile with tile*row_bytes <= ~1 MiB that divides seq_len and
    satisfies the (8,128) sublane rule (multiple of 8, or the full extent).
    ~1 MiB blocks * 2-deep in/out buffering stays well under scoped VMEM on
    v5e (16 MiB), v6e (32 MiB) and v7x (32 MiB of 64 MiB physical)."""
    cap = max(8, target_bytes // max(row_bytes, 1))
    if seq_len <= cap:
        return seq_len
    t = (min(cap, seq_len) // 8) * 8
    while t >= 8:
        if seq_len % t == 0:
            return t
        t -= 8
    return seq_len  # fallback: single block


def positional_encoding(x, *, p_drop=0.1, train=False, seed=0, tile_s=None):
    """x: [seq_len, batch, d_model]. Returns x + pe (with dropout if train=True)."""
    S, B, D = x.shape
    bd = B * D
    if tile_s is None:
        tile_s = _choose_tile_s(S, bd * x.dtype.itemsize)
    assert S % tile_s == 0, "seq_len must be divisible by tile_s"
    grid = (S // tile_s,)

    x2 = x.reshape(S, bd)  # lane-dense slab; contiguous reshape is free

    kernel = functools.partial(
        _pe_kernel, tile_s=tile_s, batch=B, d_model=D,
        p_drop=float(p_drop), train=bool(train), seed=int(seed))

    out2 = pl.pallas_call(
        kernel,
        out_shape=jax.ShapeDtypeStruct((S, bd), x.dtype),
        grid=grid,
        in_specs=[pl.BlockSpec((tile_s, bd), lambda i: (i, 0))],
        out_specs=pl.BlockSpec((tile_s, bd), lambda i: (i, 0)),
        compiler_params=pltpu.CompilerParams(
            dimension_semantics=("parallel",)),
    )(x2)
    return out2.reshape(S, B, D)


def _reference_pe(S, D):
    """Plain-JAX reference identical to the PyTorch buffer construction."""
    position = jnp.arange(S, dtype=jnp.float32)[:, None]              # [S, 1]
    div_term = jnp.exp(jnp.arange(0, D, 2, dtype=jnp.float32)
                       * (-_LN10000 / D))                             # [D/2]
    pe = jnp.zeros((S, 1, D), dtype=jnp.float32)
    pe = pe.at[:, 0, 0::2].set(jnp.sin(position * div_term))
    pe = pe.at[:, 0, 1::2].set(jnp.cos(position * div_term))
    return pe


if __name__ == "__main__":
    key = jax.random.PRNGKey(0)
    seq_len, batch, d_model = 8, 2, 32
    x = jax.random.normal(key, (seq_len, batch, d_model), dtype=jnp.float32)

    # eval-mode forward (dropout = identity): check against reference
    out = positional_encoding(x, p_drop=0.1, train=False)
    out = jax.block_until_ready(out)
    ref = x + _reference_pe(seq_len, d_model)
    assert out.shape == x.shape and out.dtype == x.dtype
    assert jnp.allclose(out, ref, atol=1e-4, rtol=1e-4), "mismatch vs reference"

    # train-mode forward: kept elements equal (x+pe)/(1-p), dropped are exactly 0
    p = 0.1
    out_tr = positional_encoding(x, p_drop=p, train=True, seed=1234)
    out_tr = jax.block_until_ready(out_tr)
    assert out_tr.shape == x.shape and out_tr.dtype == x.dtype
    expected = ref / (1.0 - p)
    kept = out_tr != 0
    assert jnp.allclose(jnp.where(kept, out_tr, expected), expected,
                        atol=1e-4, rtol=1e-4), "train-mode kept values mismatch"

    print("KERNEL_OK")
</pallas_src>

<mosaic_0001>
module attributes {stable_mosaic.version = 11 : i64} {
  func.func @_pe_kernel(%arg0: i32, %arg1: memref<8x64xf32, #tpu.memory_space<vmem>>, %arg2: memref<8x64xf32, #tpu.memory_space<vmem>>) attributes {dimension_semantics = [#tpu.dimension_semantics<parallel>], iteration_bounds = array<i64: 1>, scalar_prefetch = 0 : i64, scratch_operands = 0 : i64, tpu.core_type = #tpu.core_type<tc>, window_params = [{transform_indices = @transform_0, window_bounds = array<i64: 8, 64>}, {transform_indices = @transform_1, window_bounds = array<i64: 8, 64>}]} {
    %c8_i32 = arith.constant 8 : i32
    %0 = arith.muli %arg0, %c8_i32 : i32
    %1 = tpu.iota {dimensions = array<i32: 1>} : vector<1x32xi32>
    %c2_i32 = arith.constant 2 : i32
    %c0_i32 = arith.constant 0 : i32
    %2 = arith.cmpi eq, %c2_i32, %c0_i32 : i32
    %c1_i32 = arith.constant 1 : i32
    %3 = arith.select %2, %c1_i32, %c2_i32 : i32
    %4 = vector.broadcast %3 : i32 to vector<1x32xi32>
    %5 = arith.remsi %1, %4 : vector<1x32xi32>
    %c0_i32_0 = arith.constant 0 : i32
    %6 = vector.broadcast %c0_i32_0 : i32 to vector<1x32xi32>
    %7 = arith.cmpi ne, %5, %6 : vector<1x32xi32>
    %c0_i32_1 = arith.constant 0 : i32
    %8 = vector.broadcast %c0_i32_1 : i32 to vector<1x32xi32>
    %9 = arith.cmpi slt, %5, %8 : vector<1x32xi32>
    %c0_i32_2 = arith.constant 0 : i32
    %10 = arith.cmpi slt, %3, %c0_i32_2 : i32
    %11 = vector.broadcast %10 : i1 to vector<1x32xi1>
    %12 = vector.broadcast %11 : vector<1x32xi1> to vector<1x32xi1>
    %13 = arith.xori %9, %12 : vector<1x32xi1>
    %14 = arith.andi %13, %7 : vector<1x32xi1>
    %15 = vector.broadcast %3 : i32 to vector<1x32xi32>
    %16 = arith.addi %5, %15 : vector<1x32xi32>
    %17 = arith.select %14, %16, %5 : vector<1x32xi1>, vector<1x32xi32>
    %18 = arith.subi %1, %17 : vector<1x32xi32>
    %19 = arith.sitofp %18 : vector<1x32xi32> to vector<1x32xf32>
    %cst = arith.constant -0.287823141 : f32
    %20 = vector.broadcast %cst : f32 to vector<1x32xf32>
    %21 = arith.mulf %19, %20 : vector<1x32xf32>
    %22 = math.exp %21 : vector<1x32xf32>
    %c2_i32_3 = arith.constant 2 : i32
    %c0_i32_4 = arith.constant 0 : i32
    %23 = arith.cmpi eq, %c2_i32_3, %c0_i32_4 : i32
    %c1_i32_5 = arith.constant 1 : i32
    %24 = arith.select %23, %c1_i32_5, %c2_i32_3 : i32
    %25 = vector.broadcast %24 : i32 to vector<1x32xi32>
    %26 = arith.remsi %1, %25 : vector<1x32xi32>
    %c0_i32_6 = arith.constant 0 : i32
    %27 = vector.broadcast %c0_i32_6 : i32 to vector<1x32xi32>
    %28 = arith.cmpi ne, %26, %27 : vector<1x32xi32>
    %c0_i32_7 = arith.constant 0 : i32
    %29 = vector.broadcast %c0_i32_7 : i32 to vector<1x32xi32>
    %30 = arith.cmpi slt, %26, %29 : vector<1x32xi32>
    %c0_i32_8 = arith.constant 0 : i32
    %31 = arith.cmpi slt, %24, %c0_i32_8 : i32
    %32 = vector.broadcast %31 : i1 to vector<1x32xi1>
    %33 = vector.broadcast %32 : vector<1x32xi1> to vector<1x32xi1>
    %34 = arith.xori %30, %33 : vector<1x32xi1>
    %35 = arith.andi %34, %28 : vector<1x32xi1>
    %36 = vector.broadcast %24 : i32 to vector<1x32xi32>
    %37 = arith.addi %26, %36 : vector<1x32xi32>
    %38 = arith.select %35, %37, %26 : vector<1x32xi1>, vector<1x32xi32>
    %39 = arith.sitofp %38 : vector<1x32xi32> to vector<1x32xf32>
    %cst_9 = arith.constant 1.57079637 : f32
    %40 = vector.broadcast %cst_9 : f32 to vector<1x32xf32>
    %41 = arith.mulf %39, %40 : vector<1x32xf32>
    %42 = tpu.iota {dimensions = array<i32: 0>} : vector<8x32xi32>
    %43 = vector.broadcast %0 : i32 to vector<8x32xi32>
    %44 = arith.addi %42, %43 : vector<8x32xi32>
    %45 = arith.sitofp %44 : vector<8x32xi32> to vector<8x32xf32>
    %46 = vector.broadcast %22 : vector<1x32xf32> to vector<8x32xf32>
    %47 = arith.mulf %45, %46 : vector<8x32xf32>
    %48 = vector.broadcast %41 : vector<1x32xf32> to vector<8x32xf32>
    %49 = arith.addf %47, %48 : vector<8x32xf32>
    %50 = math.sin %49 : vector<8x32xf32>
    %51 = tpu.concatenate %50, %50 in 1 : vector<8x32xf32>, vector<8x32xf32> -> vector<8x64xf32>
    %c0 = arith.constant 0 : index
    %c0_10 = arith.constant 0 : index
    %52 = vector.load %arg1[%c0, %c0_10] : memref<8x64xf32, #tpu.memory_space<vmem>>, vector<8x64xf32>
    %53 = arith.addf %52, %51 : vector<8x64xf32>
    %c0_11 = arith.constant 0 : index
    %c0_12 = arith.constant 0 : index
    %54 = vector.load %arg2[%c0_11, %c0_12] : memref<8x64xf32, #tpu.memory_space<vmem>>, vector<8x64xf32>
    tpu.vector_store %arg2[%c0_11, %c0_12], %53 {strides = array<i32>} : memref<8x64xf32, #tpu.memory_space<vmem>>, vector<8x64xf32>,
    return
  }
  func.func @transform_0(%arg0: i32) -> (i32, i32) {
    %c0_i32 = arith.constant 0 : i32
    %c0_i32_0 = arith.constant 0 : i32
    return %arg0, %c0_i32 : i32, i32
  }
  func.func @transform_1(%arg0: i32) -> (i32, i32) {
    %c0_i32 = arith.constant 0 : i32
    %c0_i32_0 = arith.constant 0 : i32
    return %arg0, %c0_i32 : i32, i32
  }
}

</mosaic_0001>

<bundles_post_ra>
// kernel: tpu_custom_call.1
= control target key start
LH: loop header
LB: loop body
LE: loop exit
PB: predicated region body
PF: predicated region fallthrough
CT: control target
= control target key end

     0   :  { %6 = vsyncpa [#allocation3], 0  ;;  %s373_s0 = inlined_call_operand.hbm [shape: f32[8,64], index: 0, kind: input, shape index: {}]   ;;  %s374_s1 = inlined_call_operand.hbm [shape: f32[8,64], index: 1, kind: output, shape index: {}]  }
   0x1   :  { %7 = vsyncpa [#allocation4], 0  ;;  %s13_s8 = sshll.u32 %s373_s0, 4  ;;  %s301_s9 = smov [#allocation2]   ;;  %v24_v0 = vlaneseq  ;;  %s14_s8 = int_to_ptr.hbm [resolvable:$true] %s13_s8 }
   0x2   :  { %s15_s10 = sshll.u32 %s301_s9, 4  ;;  %s16_s10 = int_to_ptr.vmem [resolvable:$true] %s15_s10 }
   0x3   :  { %18 = dma.hbm_to_vmem [thread:$0]  %s14_s8, 128, %s16_s10, [#allocation3]  }
   0x4   :  { %297 = dma.done.wait [#allocation3], 128  }
   0x5   :  { %298 = vsyncadd [#allocation3], 4294967168  ;;  %v25_v1 = vand.u32 127, %v24_v0  ;;  %v46_v7 = vshrl.u32 %v24_v0, 7  ;;  %v302_v25 = vmov 683565275  }
   0x6   :  { %v303_v27 = vmov 2475754826   ;;  %v304_v29 = vmov 2131351028   ;;  %v305_v31 = vmov 2102212464  }
   0x7   :  { %v30_v2 = vand.u32 1, %v25_v1  ;;  %v49_v9 = vcvt.s32.f32 %v46_v7  ;;  %v306_v33 = vmov 920167782   ;;  %v307_v39 = vmov 1326507024   ;;  %s309_s0 = smov 32  }
   0x8   :  { %s310_s11 = smov [#allocation5]   ;;  %s224_s15 = sshll.u32 %s374_s1, 4  ;;  %s225_s15 = int_to_ptr.hbm [resolvable:$true] %s224_s15 }
   0x9   :  { %v38_v3 = vsub.s32 %v25_v1, %v30_v2  ;;  %v43_v8 = vcvt.s32.f32 %v30_v2  ;;  %s222_s12 = sshll.u32 %s310_s11, 4  ;;  %s223_s12 = int_to_ptr.vmem [resolvable:$true] %s222_s12 }
   0xb   :  { %v39_v4 = vcvt.s32.f32 %v38_v3  ;;  %v44_v10 = vmul.f32 1.5707964, %v43_v8 }
   0xd   :  { %v40_v5 = vmul.f32 -0.28782314, %v39_v4 }
   0xf   :  { %v41_v6 = vmul.f32 1.442695, %v40_v5 }
  0x11   :  { %247 = vpow2.f32 %v41_v6 }
  0x17   :  { %v248_v11 = vpop.eup %247 }
  0x18   :  { %v50_v12 = vmul.f32 %v248_v11, %v49_v9 }
  0x1a   :  { %v324_v13 = vadd.f32 %v50_v12, %v44_v10 }
  0x1c   :  { %v55_v14 = vand.u32 2139095040, %v324_v13  ;;  %v52_v16 = vand.u32 2147483647, %v324_v13  ;;  %vm54_vm12 = vcmp.lt.s32.totalorder %v324_v13, 0 }
  0x1e   :  { %v56_v15 = vshrl.u32 %v55_v14, 23  ;;  %v59_v19 = vand.u32 8388607, %v52_v16  ;;  %v308_v14 = vmov 0   ;;  %vm53_vm13 = vcmp.le.f32.partialorder %v52_v16, 0.7853982 }
  0x20   :  { %v234_v17 = vadd.s32 4294967169, %v56_v15  ;;  %v60_v22 = vor.u32 8388608, %v59_v19 }
  0x22   :  { %v62_v18 = vadd.s32 1, %v234_v17  ;;  %v333_v41 = vshll.u32 %v60_v22, 8 }
  0x24   :  { %vm63_vm0 = vcmp.gt.s32.totalorder %v62_v18, 0  ;;  %v101_v53 = vand.u32 65535, %v333_v41  ;;  %v102_v54 = vshrl.u32 %v333_v41, 16 }
  0x25   :  { %v64_v20 = vsel %vm63_vm0, %v62_v18, 0 }
  0x26   :  { %v66_v21 = vand.u32 31, %v64_v20  ;;  %v330_v23 = vshrl.u32 %v64_v20, 5 }
  0x28   :  { %v67_v24 = vsub.s32 32, %v66_v21  ;;  %v69_v26 = vshll.u32 %v302_v25, %v66_v21  ;;  %v72_v28 = vshll.u32 %v303_v27, %v66_v21  ;;  %v75_v30 = vshll.u32 %v304_v29, %v66_v21 }
  0x29   :  { %v78_v32 = vshll.u32 %v305_v31, %v66_v21  ;;  %v81_v34 = vshll.u32 %v306_v33, %v66_v21  ;;  %vm84_vm1 = vcmp.lt.s32.totalorder %v330_v23, 1  ;;  %vm87_vm2 = vcmp.lt.s32.totalorder %v330_v23, 4 }
  0x2a   :  { %v70_v35 = vshrl.u32 %v303_v27, %v67_v24  ;;  %v73_v36 = vshrl.u32 %v304_v29, %v67_v24  ;;  %v76_v37 = vshrl.u32 %v305_v31, %v67_v24  ;;  %v79_v38 = vshrl.u32 %v306_v33, %v67_v24 }
  0x2b   :  { %v82_v40 = vshrl.u32 %v307_v39, %v67_v24  ;;  %vm86_vm3 = vcmp.lt.s32.totalorder %v330_v23, 3  ;;  %vm85_vm4 = vcmp.lt.s32.totalorder %v330_v23, 2  ;;  %v68_v61 = vshrl.u32 %v302_v25, %v67_v24 }
  0x2c   :  { %v71_v42 = vor.u32 %v70_v35, %v69_v26  ;;  %v74_v43 = vor.u32 %v73_v36, %v72_v28  ;;  %v77_v44 = vor.u32 %v76_v37, %v75_v30  ;;  %v80_v45 = vor.u32 %v79_v38, %v78_v32 }
  0x2d   :  { %v83_v46 = vor.u32 %v82_v40, %v81_v34 }
  0x2e   :  { %v92_v47 = vsel %vm84_vm1, %v71_v42, %v74_v43  ;;  %v96_v48 = vsel %vm84_vm1, %v74_v43, %v77_v44  ;;  %v93_v49 = vsel %vm87_vm2, %v80_v45, 920167782  ;;  %v88_v10 = vsel %vm84_vm1, %v68_v61, %v71_v42 }
  0x2f   :  { %v97_v50 = vsel %vm87_vm2, %v83_v46, 1326507024  ;;  %v94_v51 = vsel %vm86_vm3, %v77_v44, %v93_v49  ;;  %v89_v12 = vsel %vm87_vm2, %v77_v44, 2102212464  ;;  %vm195_vm1 = vweird.f32 %v324_v13 }
  0x30   :  { %v98_v52 = vsel %vm86_vm3, %v80_v45, %v97_v50  ;;  %v95_v55 = vsel %vm85_vm4, %v92_v47, %v94_v51  ;;  %v90_v25 = vsel %vm86_vm3, %v74_v43, %v89_v12  ;;  %vm211_vm2 = vcmask 261120  }
  0x31   :  { %v99_v56 = vsel %vm85_vm4, %v96_v48, %v98_v52  ;;  %v125_v59 = vand.u32 65535, %v95_v55  ;;  %v126_v60 = vshrl.u32 %v95_v55, 16  ;;  %v91_v33 = vsel %vm85_vm4, %v88_v10, %v90_v25 }
  0x32   :  { %v103_v57 = vand.u32 65535, %v99_v56  ;;  %v104_v58 = vshrl.u32 %v99_v56, 16  ;;  %v145_v37 = vmul.u32 %v333_v41, %v91_v33  ;;  %vm215_vm3 = vcmask 523264  }
  0x33   :  { %v127_v1 = vmul.u32 %v125_v59, %v101_v53  ;;  %v128_v2 = vmul.u32 %v126_v60, %v101_v53  ;;  %v129_v3 = vmul.u32 %v125_v59, %v102_v54  ;;  %v130_v7 = vmul.u32 %v126_v60, %v102_v54 }
  0x34   :  { %v105_v62 = vmul.u32 %v103_v57, %v101_v53  ;;  %v106_v63 = vmul.u32 %v104_v58, %v101_v53  ;;  %v107_v0 = vmul.u32 %v103_v57, %v102_v54  ;;  %v108_v4 = vmul.u32 %v104_v58, %v102_v54 }
  0x35   :  { %v131_v8 = vshll.u32 %v128_v2, 16  ;;  %v133_v9 = vshll.u32 %v129_v3, 16  ;;  %v132_v22 = vshrl.u32 %v128_v2, 16  ;;  %v134_v29 = vshrl.u32 %v129_v3, 16 }
  0x36   :  { %v109_v5 = vshll.u32 %v106_v63, 16  ;;  %v111_v6 = vshll.u32 %v107_v0, 16  ;;  %v110_v18 = vshrl.u32 %v106_v63, 16  ;;  %v112_v26 = vshrl.u32 %v107_v0, 16 }
  0x37   :  { %vm135_vm6 = vc.u32 %v127_v1, %v131_v8  ;;  %v137_v17 = vadd.s32 %v131_v8, %v127_v1 }
  0x38   :  { %vm113_vm5 = vc.u32 %v105_v62, %v109_v5  ;;  %v115_v11 = vadd.s32 %v109_v5, %v105_v62  ;;  %v136_v20 = vsel %vm135_vm6, 1, %v308_v14 }
  0x39   :  { %v114_v15 = vsel %vm113_vm5, 1, %v308_v14  ;;  %v138_v24 = vadd.s32 %v136_v20, %v130_v7  ;;  %vm139_vm8 = vc.u32 %v137_v17, %v133_v9  ;;  %v141_v32 = vadd.s32 %v137_v17, %v133_v9 }
  0x3a   :  { %v116_v19 = vadd.s32 %v114_v15, %v108_v4  ;;  %vm117_vm7 = vc.u32 %v115_v11, %v111_v6  ;;  %v140_v28 = vsel %vm139_vm8, 1, %v308_v14 }
  0x3b   :  { %v118_v21 = vsel %vm117_vm7, 1, %v308_v14  ;;  %v142_v30 = vadd.s32 %v140_v28, %v138_v24 }
  0x3c   :  { %v120_v27 = vadd.s32 %v118_v21, %v116_v19 }
  0x3d   :  { %v143_v34 = vadd.s32 %v142_v30, %v132_v22 }
  0x3e   :  { %v121_v31 = vadd.s32 %v120_v27, %v110_v18  ;;  %v213_v27 = vld [vmem:[#allocation2] sm:$0xff] }
  0x3f   :  { %v144_v36 = vadd.s32 %v143_v34, %v134_v29 }
  0x40   :  { %v122_v35 = vadd.s32 %v121_v31, %v112_v26 }
  0x41   :  { %v148_v38 = vadd.s32 1, %v144_v36 }
  0x42   :  { %vm147_vm9 = vc.u32 %v122_v35, %v141_v32  ;;  %v146_v23 = vadd.s32 %v141_v32, %v122_v35 }
  0x43   :  { %v149_v39 = vsel %vm147_vm9, %v148_v38, %v144_v36 }
  0x44   :  { %v150_v40 = vadd.s32 %v149_v39, %v145_v37 }
  0x46   :  { %v151_v42 = vadd.s32 536870912, %v150_v40 }
  0x48   :  { %v152_v43 = vshrl.u32 %v151_v42, 30 }
  0x4a   :  { %v153_v44 = vshll.u32 %v152_v43, 30  ;;  %v176_v61 = vsub.s32 4, %v152_v43 }
  0x4c   :  { %v154_v45 = vsub.s32 %v150_v40, %v153_v44  ;;  %v177_v0 = vsel %vm54_vm12, %v176_v61, %v152_v43 }
  0x4d   :  { %v179_v3 = vsel %vm53_vm13, 0, %v177_v0 }
  0x4e   :  { %vm155_vm10 = vcmp.lt.s32.totalorder %v154_v45, 0  ;;  %v156_v46 = vsub.s32 0, %v154_v45  ;;  %v196_v8 = vadd.s32 3, %v179_v3 }
  0x50   :  { %v157_v47 = vsel %vm155_vm10, %v156_v46, %v154_v45  ;;  %v197_v14 = vand.u32 3, %v196_v8 }
  0x51   :  { %v158_v48 = vclz %v157_v47 }
  0x52   :  { %vm202_vm14 = vcmp.eq.s32.totalorder %v197_v14, 2  ;;  %vm199_vm15 = vcmp.eq.s32.totalorder %v197_v14, 0  ;;  %vm198_vm0 = vcmp.lt.s32.totalorder %v197_v14, 2 }
  0x53   :  { %v235_v49 = vadd.s32 4294967294, %v158_v48 }
  0x55   :  { %vm236_vm11 = vcmp.lt.s32.totalorder %v235_v49, 0 }
  0x56   :  { %v161_v50 = vsel %vm236_vm11, 0, %v235_v49 }
  0x57   :  { %v162_v51 = vsub.s32 32, %v161_v50  ;;  %v163_v52 = vshll.u32 %v154_v45, %v161_v50  ;;  %v166_v53 = vsub.s32 4294967266, %v161_v50 }
  0x59   :  { %v164_v41 = vshrl.u32 %v146_v23, %v162_v51  ;;  %v167_v54 = vadd.s32 127, %v166_v53 }
  0x5b   :  { %v165_v55 = vor.u32 %v164_v41, %v163_v52  ;;  %v168_v56 = vshll.u32 %v167_v54, 23 }
  0x5d   :  { %v169_v57 = vor.u32 4788187, %v168_v56  ;;  %v172_v58 = vcvt.s32.f32 %v165_v55 }
  0x5f   :  { %v170_v59 = vand.u32 2147483647, %v169_v57 }
  0x61   :  { %v173_v60 = vmul.f32 %v172_v58, %v170_v59 }
  0x63   :  { %v174_v62 = vxor.u32 2147483648, %v173_v60 }
  0x65   :  { %v175_v63 = vsel %vm54_vm12, %v174_v62, %v173_v60 }
  0x66   :  { %v178_v1 = vsel %vm53_vm13, %v324_v13, %v175_v63 }
  0x67   :  { %v180_v2 = vmul.f32 %v178_v1, %v178_v1 }
  0x69   :  { %v181_v4 = vmul.f32 -0.001358992, %v180_v2  ;;  %v188_v5 = vmul.f32 -0.00019511016, %v180_v2 }
  0x6b   :  { %v182_v6 = vadd.f32 0.041655596, %v181_v4  ;;  %v189_v7 = vadd.f32 0.008332121, %v188_v5 }
  0x6d   :  { %v183_v9 = vmul.f32 %v182_v6, %v180_v2  ;;  %v190_v10 = vmul.f32 %v189_v7, %v180_v2 }
  0x6f   :  { %v184_v11 = vadd.f32 -0.4999988, %v183_v9  ;;  %v191_v12 = vadd.f32 -0.16666654, %v190_v10 }
  0x71   :  { %v185_v15 = vmul.f32 %v184_v11, %v180_v2  ;;  %v192_v17 = vmul.f32 %v191_v12, %v180_v2 }
  0x73   :  { %v186_v16 = vadd.f32 1.0, %v185_v15  ;;  %v193_v18 = vadd.f32 1.0, %v192_v17 }
  0x75   :  { %v194_v19 = vmul.f32 %v193_v18, %v178_v1  ;;  %v203_v20 = vxor.u32 2147483648, %v186_v16 }
  0x77   :  { %v200_v21 = vxor.u32 2147483648, %v194_v19  ;;  %v204_v22 = vsel %vm202_vm14, %v203_v20, %v194_v19 }
  0x79   :  { %v201_v24 = vsel %vm199_vm15, %v186_v16, %v200_v21 }
  0x7a   :  { %v205_v25 = vsel %vm198_vm0, %v201_v24, %v204_v22 }
  0x7b   :  { %v206_v26 = vsel %vm195_vm1, nan, %v205_v25 }
  0x7c   :  { %208 = vrot.lane.b32.xlu0 %v206_v26, %s309_s0 }
  0xee   :  { %v209_v28 = vpop.permute.xlu0 %208 }
  0xef   :  { %v212_v29 = vsel %vm211_vm2, %v206_v26, %v209_v28 }
  0xf0   :  { %v214_v30 = vadd.f32 %v213_v27, %v212_v29 }
  0xf2   :  { %216 = vst.msk [vmem:[#allocation5] sm:$0xff] %vm215_vm3, %v214_v30 }
  0xf3   :  { %227 = dma.vmem_to_hbm [thread:$0]  %s223_s12, 128, %s225_s15, [#allocation4]  }
  0xf4   :  { %299 = dma.done.wait [#allocation4], 128  }
  0xf5   :  { %300 = vsyncadd [#allocation4], 4294967168 }
  0xf6   :  { %232 = vsyncpa [#allocation3], 1 }
  0xf7   :  { %233 = vsyncpa [#allocation4], 1 }

</bundles_post_ra>
